<compile_context>
chip_gen: v7x
topology: tpu7x:2x2x1
jax: 0.10.0
libtpu: 0.0.40
codegen_flags: <defaults>
</compile_context>

<pallas_src>
from functools import partial

import jax
import jax.numpy as jnp
from jax.experimental import pallas as pl
from jax.experimental.pallas import tpu as pltpu


# ----------------------------------------------------------------------------
# Pass 1: per-document attention pooling + hoisted GRU input projection.
# One document (1, S, D) per grid step; grid axis B is fully parallel.
# ----------------------------------------------------------------------------
def _pool_proj_kernel(hs_ref,        # [S, D]   one document (bf16/f32)
                      w_att_ref,     # [1, D]   attention weight row
                      w_ih_t_ref,    # [D, 3H]  GRU input weights (pre-transposed)
                      b_ih_ref,      # [1, 3H]
                      gi_ref):       # [1, 3H]  output: gi_b = wlr_b @ W_ih^T + b_ih
    hs = hs_ref[...].astype(jnp.float32)                          # [S, D]
    S = hs.shape[0]

    # Attention scores: VPU mul + lane (XLU) reduce; keeps the MXU free for
    # the pooling / projection matmuls.  The nn.Linear(D, 1) bias is dropped:
    # softmax over the sequence is shift-invariant, so the bias is inert
    # (the f32 reference below keeps it and still matches).
    scores = jnp.sum(hs * w_att_ref[...], axis=1, keepdims=True)  # [S, 1]
    m = jnp.max(scores, axis=0, keepdims=True)
    e = jnp.exp(scores - m)
    alpha = e / jnp.sum(e, axis=0, keepdims=True)                 # softmax over S

    # word_level_representation: the S-reduction runs as a [1,S]x[S,D] MXU
    # matmul against a ones row (no sublane reduce, no [B,S,D] temporary).
    weighted = hs * alpha                                         # [S, D]
    wlr = jnp.dot(jnp.ones((1, S), jnp.float32), weighted,
                  preferred_element_type=jnp.float32)             # [1, D]

    # Hoisted, B-parallel GRU input projection (one [1,D]x[D,3H] MXU matmul),
    # so the sequential pass only has the h-dependent recurrence left.
    gi_ref[...] = (jnp.dot(wlr, w_ih_t_ref[...],
                           preferred_element_type=jnp.float32)
                   + b_ih_ref[...])                               # [1, 3H]


# ----------------------------------------------------------------------------
# Pass 2: GRU recurrence over the length-B sequence (batch=1, h0=0) + final fc.
# Tiny and inherently sequential.
# ----------------------------------------------------------------------------
def _gru_fc_kernel(gi_ref,                     # [B, 3H]  precomputed input proj
                   w_hh_t_ref, b_hh_ref,       # [H, 3H], [1, 3H]
                   w_fc_t_ref, b_fc_ref,       # [H, O],  [1, O]
                   out_ref,                    # [1, O]
                   *, hidden_dim):
    H = hidden_dim
    B = gi_ref.shape[0]
    w_hh_t = w_hh_t_ref[...]                                      # [H, 3H]
    b_hh = b_hh_ref[...]                                          # [1, 3H]

    def gru_step(t, h):                                           # h: [1, H]
        gi = gi_ref[pl.ds(t, 1), :]                               # [1, 3H]
        gh = jnp.dot(h, w_hh_t,
                     preferred_element_type=jnp.float32) + b_hh   # [1, 3H]
        r = jax.nn.sigmoid(gi[:, 0:H] + gh[:, 0:H])
        z = jax.nn.sigmoid(gi[:, H:2 * H] + gh[:, H:2 * H])
        n = jnp.tanh(gi[:, 2 * H:3 * H] + r * gh[:, 2 * H:3 * H])
        return (1.0 - z) * n + z * h

    h_last = jax.lax.fori_loop(0, B, gru_step,
                               jnp.zeros((1, H), jnp.float32),
                               unroll=True)

    out = (jnp.dot(h_last, w_fc_t_ref[...],
                   preferred_element_type=jnp.float32)
           + b_fc_ref[...])                                       # [1, O]
    out_ref[...] = out.astype(out_ref.dtype)


def han_forward(hidden_states, params, *, hidden_dim, output_dim,
                vmem_limit_bytes=32 * 1024 * 1024):
    """Fused HAN head.  hidden_states: [B, S, D] (bf16 recommended, f32 ok)."""
    B, S, D = hidden_states.shape
    H = hidden_dim

    # ---- Pass 1: B-parallel pooling + GRU input projection -> gi [B, 1, 3H] ----
    # Output kept 3-D so every block's trailing two dims equal the full array
    # dims (respects the (8,128) BlockSpec constraint); squeezed afterwards.
    gi = pl.pallas_call(
        _pool_proj_kernel,
        grid_spec=pltpu.PrefetchScalarGridSpec(
            num_scalar_prefetch=0,
            grid=(B,),
            in_specs=[
                # One document per grid step; leading B dim squeezed out.
                # (1, S, D) bf16 at production sizes (512x768) ~0.75 MiB per
                # buffer -> ~1.5 MiB double-buffered: safe on v7x's 64 MiB VMEM.
                pl.BlockSpec((None, S, D), lambda b: (b, 0, 0)),
                # Weights: constant block index -> stay VMEM resident.
                pl.BlockSpec((1, D), lambda b: (0, 0)),            # w_att
                pl.BlockSpec((D, 3 * H), lambda b: (0, 0)),        # w_ih_t
                pl.BlockSpec((1, 3 * H), lambda b: (0, 0)),        # b_ih
            ],
            out_specs=pl.BlockSpec((None, 1, 3 * H), lambda b: (b, 0, 0)),
        ),
        out_shape=jax.ShapeDtypeStruct((B, 1, 3 * H), jnp.float32),
        compiler_params=pltpu.CompilerParams(
            # No cross-step state in this pass -> shardable across v7x's 2 TCs.
            dimension_semantics=("parallel",),
            vmem_limit_bytes=vmem_limit_bytes,
        ),
    )(hidden_states, params["w_att"], params["w_ih_t"], params["b_ih"])

    gi = gi.reshape(B, 3 * H)   # tiny (B x 3H) HBM round-trip between passes

    # ---- Pass 2: sequential GRU recurrence + fc -> [1, O] ----
    out = pl.pallas_call(
        partial(_gru_fc_kernel, hidden_dim=H),
        grid_spec=pltpu.PrefetchScalarGridSpec(
            num_scalar_prefetch=0,
            grid=(1,),
            in_specs=[
                pl.BlockSpec((B, 3 * H), lambda i: (0, 0)),        # gi
                pl.BlockSpec((H, 3 * H), lambda i: (0, 0)),        # w_hh_t
                pl.BlockSpec((1, 3 * H), lambda i: (0, 0)),        # b_hh
                pl.BlockSpec((H, output_dim), lambda i: (0, 0)),   # w_fc_t
                pl.BlockSpec((1, output_dim), lambda i: (0, 0)),   # b_fc
            ],
            out_specs=pl.BlockSpec((1, output_dim), lambda i: (0, 0)),
        ),
        out_shape=jax.ShapeDtypeStruct((1, output_dim), jnp.float32),
        compiler_params=pltpu.CompilerParams(
            dimension_semantics=("arbitrary",),
        ),
    )(gi, params["w_hh_t"], params["b_hh"], params["w_fc_t"], params["b_fc"])
    return out


# ----------------------------------------------------------------------------
# Pure-JAX reference (same math, f32, attention bias included) for correctness.
# ----------------------------------------------------------------------------
def han_reference(hs, p, *, hidden_dim):
    H = hidden_dim
    scores = jnp.einsum("bsd,d->bs", hs, p["w_att"][0]) + p["b_att"]   # [B, S]
    alpha = jax.nn.softmax(scores, axis=1)[..., None]                  # [B, S, 1]
    wlr = jnp.sum(hs * alpha, axis=1)                                  # [B, D]
    h = jnp.zeros((1, H), jnp.float32)
    for t in range(hs.shape[0]):
        x = wlr[t:t + 1]
        gi = x @ p["w_ih_t"] + p["b_ih"]
        gh = h @ p["w_hh_t"] + p["b_hh"]
        r = jax.nn.sigmoid(gi[:, :H] + gh[:, :H])
        z = jax.nn.sigmoid(gi[:, H:2 * H] + gh[:, H:2 * H])
        n = jnp.tanh(gi[:, 2 * H:] + r * gh[:, 2 * H:])
        h = (1.0 - z) * n + z * h
    return h @ p["w_fc_t"] + p["b_fc"]


if __name__ == "__main__":
    # Small shapes consistent with the module's forward semantics.
    B, S = 2, 8            # batch of documents, tokens per document
    D = 32                 # stand-in for bert hidden size (768 in the original)
    HIDDEN = 32            # stand-in for hidden_dim (256 in the original)
    OUT = 2                # output_dim
    VOCAB = 50

    key = jax.random.PRNGKey(0)
    ks = jax.random.split(key, 10)

    # Model inputs (as in the PyTorch forward signature).
    input_ids = jax.random.randint(ks[0], (B, S), 0, VOCAB, dtype=jnp.int32)
    attention_mask = jnp.ones((B, S), dtype=jnp.int32)   # only consumed by BERT

    # TODO(synk): the pretrained BertModel encoder has no clean Pallas
    # equivalent; its `last_hidden_state` is simulated by a deterministic
    # embedding-table lookup (attention_mask is unused downstream of BERT).
    emb_table = jax.random.normal(ks[1], (VOCAB, D), dtype=jnp.float32) * 0.5
    hidden_states_f32 = emb_table[input_ids]              # [B, S, D] f32
    # Keep hidden_states in bf16 in HBM (halves DMA traffic); the kernel
    # upcasts each (1, S, D) tile to f32 for the softmax / accumulation math.
    hidden_states = hidden_states_f32.astype(jnp.bfloat16)

    # Deterministic parameter init (shapes follow the PyTorch module).
    scale = 0.1
    params = {
        # nn.Linear(D, 1): weight [1, D] (bias is inert under softmax; kept
        # only for the reference to demonstrate equivalence)
        "w_att": jax.random.normal(ks[2], (1, D), jnp.float32) * scale,
        "b_att": jax.random.normal(ks[3], (1, 1), jnp.float32) * scale,
        # nn.GRU(D, H): weight_ih_l0 [3H, D], weight_hh_l0 [3H, H] -> pre-transposed
        "w_ih_t": (jax.random.normal(ks[4], (3 * HIDDEN, D), jnp.float32) * scale).T,
        "w_hh_t": (jax.random.normal(ks[5], (3 * HIDDEN, HIDDEN), jnp.float32) * scale).T,
        "b_ih": jax.random.normal(ks[6], (1, 3 * HIDDEN), jnp.float32) * scale,
        "b_hh": jax.random.normal(ks[7], (1, 3 * HIDDEN), jnp.float32) * scale,
        # nn.Linear(H, OUT): weight [OUT, H] -> pre-transposed
        "w_fc_t": (jax.random.normal(ks[8], (OUT, HIDDEN), jnp.float32) * scale).T,
        "b_fc": jax.random.normal(ks[9], (1, OUT), jnp.float32) * scale,
    }

    out = han_forward(hidden_states, params, hidden_dim=HIDDEN, output_dim=OUT)
    out = jax.block_until_ready(out)

    ref = han_reference(hidden_states.astype(jnp.float32), params, hidden_dim=HIDDEN)
    assert out.shape == (1, OUT), out.shape
    assert jnp.allclose(out, ref, atol=1e-4, rtol=1e-4), (out, ref)

    print("KERNEL_OK")
</pallas_src>

<mosaic_0001>
module attributes {stable_mosaic.version = 11 : i64} {
  func.func @_pool_proj_kernel(%arg0: i32, %arg1: memref<1x8x32xbf16, #tpu.memory_space<vmem>>, %arg2: memref<1x32xf32, #tpu.memory_space<vmem>>, %arg3: memref<32x96xf32, #tpu.memory_space<vmem>>, %arg4: memref<1x96xf32, #tpu.memory_space<vmem>>, %arg5: memref<1x1x96xf32, #tpu.memory_space<vmem>>) attributes {dimension_semantics = [#tpu.dimension_semantics<parallel>], iteration_bounds = array<i64: 2>, scalar_prefetch = 0 : i64, scratch_operands = 0 : i64, tpu.core_type = #tpu.core_type<tc>, window_params = [{transform_indices = @transform_0, window_bounds = array<i64: 1, 8, 32>}, {pipeline_mode = #tpu.pipeline_mode<synchronous>, transform_indices = @transform_1, window_bounds = array<i64: 1, 32>}, {pipeline_mode = #tpu.pipeline_mode<synchronous>, transform_indices = @transform_2, window_bounds = array<i64: 32, 96>}, {pipeline_mode = #tpu.pipeline_mode<synchronous>, transform_indices = @transform_3, window_bounds = array<i64: 1, 96>}, {transform_indices = @transform_4, window_bounds = array<i64: 1, 1, 96>}]} {
    %c0 = arith.constant 0 : index
    %c0_0 = arith.constant 0 : index
    %c0_1 = arith.constant 0 : index
    %0 = vector.load %arg1[%c0, %c0_0, %c0_1] : memref<1x8x32xbf16, #tpu.memory_space<vmem>>, vector<1x8x32xbf16>
    %1 = vector.shape_cast %0 : vector<1x8x32xbf16> to vector<8x32xbf16>
    %2 = arith.extf %1 : vector<8x32xbf16> to vector<8x32xf32>
    %c0_2 = arith.constant 0 : index
    %c0_3 = arith.constant 0 : index
    %3 = vector.load %arg2[%c0_2, %c0_3] : memref<1x32xf32, #tpu.memory_space<vmem>>, vector<1x32xf32>
    %4 = vector.broadcast %3 : vector<1x32xf32> to vector<8x32xf32>
    %5 = arith.mulf %2, %4 : vector<8x32xf32>
    %cst = arith.constant dense<0.000000e+00> : vector<8xf32>
    %6 = vector.multi_reduction <add>, %5, %cst [1] : vector<8x32xf32> to vector<8xf32>
    %7 = vector.shape_cast %6 : vector<8xf32> to vector<8x1xf32>
    %cst_4 = arith.constant dense<0xFF800000> : vector<1xf32>
    %8 = vector.multi_reduction <maximumf>, %7, %cst_4 [0] : vector<8x1xf32> to vector<1xf32>
    %9 = vector.shape_cast %8 : vector<1xf32> to vector<1x1xf32>
    %10 = vector.broadcast %9 : vector<1x1xf32> to vector<8x1xf32>
    %11 = arith.subf %7, %10 : vector<8x1xf32>
    %12 = math.exp %11 : vector<8x1xf32>
    %cst_5 = arith.constant dense<0.000000e+00> : vector<1xf32>
    %13 = vector.multi_reduction <add>, %12, %cst_5 [0] : vector<8x1xf32> to vector<1xf32>
    %14 = vector.shape_cast %13 : vector<1xf32> to vector<1x1xf32>
    %15 = vector.broadcast %14 : vector<1x1xf32> to vector<8x1xf32>
    %16 = arith.divf %12, %15 : vector<8x1xf32>
    %17 = vector.broadcast %16 : vector<8x1xf32> to vector<8x32xf32>
    %18 = arith.mulf %2, %17 : vector<8x32xf32>
    %cst_6 = arith.constant 1.000000e+00 : f32
    %19 = vector.broadcast %cst_6 : f32 to vector<1x8xf32>
    %cst_7 = arith.constant dense<0.000000e+00> : vector<1x32xf32>
    %20 = tpu.matmul %19, %18, %cst_7 {dimension_numbers = #tpu.dot_dimension_numbers<[1], [0], [0], [1], [0, 0, 1, 1], [], []>} : vector<1x8xf32>, vector<8x32xf32>, vector<1x32xf32> -> vector<1x32xf32>
    %c0_8 = arith.constant 0 : index
    %c0_9 = arith.constant 0 : index
    %21 = vector.load %arg3[%c0_8, %c0_9] : memref<32x96xf32, #tpu.memory_space<vmem>>, vector<32x96xf32>
    %cst_10 = arith.constant dense<0.000000e+00> : vector<1x96xf32>
    %22 = tpu.matmul %20, %21, %cst_10 {dimension_numbers = #tpu.dot_dimension_numbers<[1], [0], [0], [1], [0, 0, 1, 1], [], []>} : vector<1x32xf32>, vector<32x96xf32>, vector<1x96xf32> -> vector<1x96xf32>
    %c0_11 = arith.constant 0 : index
    %c0_12 = arith.constant 0 : index
    %23 = vector.load %arg4[%c0_11, %c0_12] : memref<1x96xf32, #tpu.memory_space<vmem>>, vector<1x96xf32>
    %24 = arith.addf %22, %23 : vector<1x96xf32>
    %c0_13 = arith.constant 0 : index
    %c0_14 = arith.constant 0 : index
    %c0_15 = arith.constant 0 : index
    %25 = vector.load %arg5[%c0_13, %c0_14, %c0_15] : memref<1x1x96xf32, #tpu.memory_space<vmem>>, vector<1x1x96xf32>
    %26 = vector.shape_cast %25 : vector<1x1x96xf32> to vector<1x96xf32>
    %27 = vector.shape_cast %24 : vector<1x96xf32> to vector<1x1x96xf32>
    tpu.vector_store %arg5[%c0_13, %c0_14, %c0_15], %27 {strides = array<i32>} : memref<1x1x96xf32, #tpu.memory_space<vmem>>, vector<1x1x96xf32>,
    return
  }
  func.func @transform_0(%arg0: i32) -> (i32, i32, i32) {
    %c0_i32 = arith.constant 0 : i32
    %c0_i32_0 = arith.constant 0 : i32
    %c0_i32_1 = arith.constant 0 : i32
    return %arg0, %c0_i32, %c0_i32_0 : i32, i32, i32
  }
  func.func @transform_1(%arg0: i32) -> (i32, i32) {
    %c0_i32 = arith.constant 0 : i32
    %c0_i32_0 = arith.constant 0 : i32
    %c0_i32_1 = arith.constant 0 : i32
    return %c0_i32, %c0_i32_0 : i32, i32
  }
  func.func @transform_2(%arg0: i32) -> (i32, i32) {
    %c0_i32 = arith.constant 0 : i32
    %c0_i32_0 = arith.constant 0 : i32
    %c0_i32_1 = arith.constant 0 : i32
    return %c0_i32, %c0_i32_0 : i32, i32
  }
  func.func @transform_3(%arg0: i32) -> (i32, i32) {
    %c0_i32 = arith.constant 0 : i32
    %c0_i32_0 = arith.constant 0 : i32
    %c0_i32_1 = arith.constant 0 : i32
    return %c0_i32, %c0_i32_0 : i32, i32
  }
  func.func @transform_4(%arg0: i32) -> (i32, i32, i32) {
    %c0_i32 = arith.constant 0 : i32
    %c0_i32_0 = arith.constant 0 : i32
    %c0_i32_1 = arith.constant 0 : i32
    return %arg0, %c0_i32, %c0_i32_0 : i32, i32, i32
  }
}

</mosaic_0001>

<bundles_post_ra>
// kernel: tpu_custom_call.1
= control target key start
LH: loop header
LB: loop body
LE: loop exit
PB: predicated region body
PF: predicated region fallthrough
CT: control target
= control target key end

     0   :  { %9 = vsyncpa [#allocation3], 0  ;;  %s982_s0 = inlined_call_operand.hbm [shape: bf16[2,8,32], index: 0, kind: input, shape index: {}]   ;;  %s983_s1 = inlined_call_operand.vmem [shape: f32[1,32], index: 1, kind: input, shape index: {}]   ;;  %s984_s2 = inlined_call_operand.hbm [shape: f32[32,96], index: 2, kind: input, shape index: {}]   ;;  %s985_s3 = inlined_call_operand.vmem [shape: f32[1,96], index: 3, kind: input, shape index: {}]   ;;  %s986_s4 = inlined_call_operand.hbm [shape: f32[2,1,96], index: 4, kind: output, shape index: {}]  }
   0x1   :  { %11 = vsyncpa [#allocation3 + $0x1], 0 }
   0x2   :  { %12 = vsyncpa [#allocation6], 0 }
   0x3   :  { %13 = vsyncpa [#allocation4], 0 }
   0x4   :  { %15 = vsyncpa [#allocation4 + $0x1], 0  ;;  %s777_s15 = smov 0   ;;  %s779_s16 = smov 0  }
   0x5   :  { %s781_s17 = smov 0   ;;  %s783_s18 = smov 0  }
   0x6 LB: > { %s798_s19 = sadd.s32 4294967295, %s741_s18   ;;  %s502_s20 = sadd.s32 4294967294, %s741_s18   ;;  %s741_s18 = sphi %s783_s18, %s1006_s18   ;;  %s737_s17 = sphi %s781_s17, %s1005_s17   ;;  %s733_s16 = sphi %s779_s16, %s1004_s16   ;;  %s729_s15 = sphi %s777_s15, %s1003_s15  }
   0x7   : > { %p41_p0 = scmp.ne.s32.totalorder %s733_s16, %s729_s15  ;;  %p987_p1 = scmp.eq.s32.totalorder %s798_s19, 0 }
   0x8   : > { %p134_p3 = scmp.eq.s32.totalorder %s502_s20, 1  ;;  %p503_p5 = scmp.ge.s32.totalorder %s741_s18, 1 }
   0x9   : > { %p807_p4 = por %p987_p1, %p41_p0  ;;  %p141_p7 = scmp.lt.s32.totalorder %s741_s18, 3 }
   0xa   : > { %p812_p6 = por %p134_p3, %p41_p0  ;;  %s743_s24 = smov [#allocation5]  }
   0xb   : > { %s990_s21 = scalar_select %p807_p4, 1, 0 }
   0xc   : > { %s991_s22 = scalar_select %p812_p6, 1, 0 }
   0xd   : > { %p817_p8 = pnand %p503_p5, %p141_p7  ;;  %s156_s25 = sshll.u32 %s743_s24, 4  ;;  %s821_s25 = int_to_ptr.vmem [resolvable:$true] %s156_s25 }
   0xe   : > { %s833_s27 = sadd.s32 1, %s741_s18   ;;  %s28_s28 = sadd.s32 1, %s737_s17 }
   0xf   : > { %s992_s23 = scalar_select %p817_p8, 1, 0 }
  0x10   : > { %p554_p9 = pneg %p817_p8  ;;  %s25_s29 = ssub.s32 %s741_s18, %s833_s27 }
  0x11   : > { %s613_s6 = scalar_lea.hbm %s984_s2, 512 }
  0x12   : > { %p828_p11 = pnand %p554_p9, %p987_p1  ;;  %p614_p12 = scmp.ne.s32.totalorder %s984_s2, %s613_s6 }
  0x13   : > { %p620_p5 = scmp.lt.u32.totalorder %s613_s6, %s984_s2 }
  0x14   : > { %p615_p13 = pneg %p828_p11 }
  0x16   : > { %p616_p0 = pnand %p615_p13, %p614_p12 }
  0x18   : > { %p617_p3 = pneg %p616_p0 }
  0x1a   : > { %p622_p7 = pnand %p620_p5, %p617_p3 }
  0x1c   : > { %625 = shalt.err (!%p622_p7)
}
  0x1d   : > { %s626_s11 = scalar_lea.vmem %s821_s25, 512  ;;  %p634_p2 = scmp.lt.s32.totalorder %s821_s25, %s821_s25 }
  0x1e   : > { %p627_p9 = scmp.ne.s32.totalorder %s821_s25, %s626_s11  ;;  %p635_p6 = scmp.lt.s32.totalorder %s626_s11, %s626_s11 }
  0x20   : > { %p629_p10 = pnand %p627_p9, %p615_p13  ;;  %p636_p4 = por %p635_p6, %p634_p2 }
  0x22   : > { %p630_p1 = pneg %p629_p10 }
  0x24   : > { %p637_p8 = pnand %p636_p4, %p630_p1 }
  0x26   : > { %640 = shalt.err (!%p637_p8)
}
  0x27   : > { %s744_s12 = smov 128   ;;  %s745_s13 = smov 8  }
  0x28   : > { %557 = dma.hbm_to_vmem [thread:$0]  (!%p828_p11), %s984_s2, 512, %s821_s25, [#allocation6], %s744_s12, %s744_s12, %s745_s13  }
  0x29   : > { %p26_p2 = scmp.eq.s32.totalorder %s25_s29, 0  ;;  %p35_p1 = scmp.ne.s32.totalorder %s737_s17, %s733_s16 }
  0x2a   : > { %p36_p4 = scmp.eq.s32.totalorder %s741_s18, 0  ;;  %p567_p6 = scmp.lt.s32.totalorder %s741_s18, 2 }
  0x2b   : > { %s864_s24 = scalar_select %p26_p2, %s737_s17, %s28_s28  }
  0x2c   : > { %p37_p8 = por %p36_p4, %p35_p1  ;;  %p994_p10 = scmp.eq.s32.totalorder %s798_s19, 1 }
  0x2d   : > { %s173_s5 = sand.u32 1, %s737_s17   ;;  %s507_s6 = sshll.u32 %s741_s18, 6 }
  0x2e   : > { %p868_p12 = por %p994_p10, %p35_p1  ;;  %s506_s7 = sshll.u32 %s173_s5, 2 }
  0x2f   : > { %s877_s9 = scalar_lea.hbm %s982_s0, %s507_s6  ;;  %s177_s25 = scalar_lea.vmem [#allocation2], %s506_s7 }
  0x30   : > { %s184_s28 = sshll.u32 %s177_s25, 4  ;;  %p879_p11 = pnand %p567_p6, %p37_p8  ;;  %s883_s28 = int_to_ptr.vmem [resolvable:$true] %s184_s28 }
  0x31   : > { %s174_s10 = scalar_lea.sflag [#allocation3], %s173_s5  ;;  %s641_s11 = scalar_lea.hbm %s877_s9, 64 }
  0x32   : > { %p642_p13 = scmp.ne.s32.totalorder %s877_s9, %s641_s11  ;;  %p643_p0 = pneg %p879_p11 }
  0x33   : > { %s646_s14 = scalar_lea.hbm %s982_s0, 128  ;;  %p647_p7 = scmp.lt.u32.totalorder %s877_s9, %s982_s0 }
  0x34   : > { %p644_p3 = pnand %p643_p0, %p642_p13  ;;  %p648_p9 = scmp.lt.u32.totalorder %s646_s14, %s641_s11 }
  0x35   : > { %p650_p1 = scmp.lt.u32.totalorder %s641_s11, %s877_s9 }
  0x36   : > { %p645_p5 = pneg %p644_p3  ;;  %p649_p2 = por %p648_p9, %p647_p7 }
  0x38   : > { %p651_p4 = por %p650_p1, %p649_p2 }
  0x3a   : > { %p652_p6 = pnand %p651_p4, %p645_p5 }
  0x3c   : > { %655 = shalt.err (!%p652_p6)
}
  0x3d   : > { %s656_s5 = scalar_lea.vmem %s883_s28, 64  ;;  %s746_s7 = smov [#allocation2]  }
  0x3e   : > { %p657_p8 = scmp.ne.s32.totalorder %s883_s28, %s656_s5  ;;  %s661_s26 = sshll.u32 %s746_s7, 4  ;;  %s662_s26 = int_to_ptr.vmem [resolvable:$false] %s661_s26 }
  0x3f   : > { %s663_s8 = scalar_lea.vmem %s662_s26, 128  ;;  %p664_p3 = scmp.lt.s32.totalorder %s883_s28, %s662_s26 }
  0x40   : > { %p659_p10 = pnand %p657_p8, %p643_p0  ;;  %p665_p7 = scmp.lt.s32.totalorder %s663_s8, %s656_s5 }
  0x42   : > { %p660_p13 = pneg %p659_p10  ;;  %p666_p9 = por %p665_p7, %p664_p3 }
  0x44   : > { %p667_p2 = pnand %p666_p9, %p660_p13 }
  0x46   : > { %670 = shalt.err (!%p667_p2)
}
  0x47   : > { %561 = dma.hbm_to_vmem [thread:$0]  (!%p879_p11), %s877_s9, 64, %s883_s28, %s174_s10  }
  0x48   : > { %p997_p5 = scmp.ne.s32.totalorder %s992_s23, 0 }
  0x49   : > { %s913_s25 = sand.u32 (!%p997_p5), 1, %s733_s16   ;;  %p998_p0 = scmp.ne.s32.totalorder (!%p997_p5), %s990_s21, 0 }
  0x4a   : > { %193 = sbr.rel (%p997_p5) target bundleno = 728 (0x2d8), region = 36  ;;  %s509_s11 = sshll.u32 (!%p997_p5), %s913_s25, 2 }
  0x4b   : > { %s196_s12 = scalar_lea.sflag (!%p997_p5), [#allocation3], %s913_s25  ;;  %s199_s13 = scalar_lea.vmem (!%p997_p5), [#allocation2], %s509_s11 }
  0x51   : > { %716 = dma.done.wait (%p998_p0), %s196_s12, 64  }
  0x52   : > { %718 = vsyncadd (%p998_p0), %s196_s12, 4294967232  ;;  %p999_p1 = scmp.eq.s32.totalorder %s798_s19, 0 }
  0x54   : > { %720 = dma.done.wait (%p999_p1), [#allocation6], 512   ;;  %p1000_p11 = pmov %p999_p1 }
  0x55   : > { %v227_v0 = vld [vmem:[%s199_s13] sm:$0xf]  ;;  %vm237_vm0 = vcmask 261120   ;;  %v747_v5 = vmov 0.0   ;;  %vm748_vm1 = vmmov 0   ;;  %v333_v6 = vld [vmem:[#allocation5] sm:$0xff] }
  0x56   : > { %722 = vsyncadd (%p1000_p11), [#allocation6], 4294966784  ;;  %v511_v1 = vld [vmem:[%s983_s1] ss:$0 sm:$0xff]  ;;  %v228_v2 = vunpack.c.l.bf16 %v227_v0  ;;  %524 = vmatprep.subr.mxu0 %v747_v5  ;;  %526 = vmatprep.mubr.msk.f32.mxu0 %vm748_vm1, %v747_v5  ;;  %v334_v7 = vld [vmem:[#allocation5 + $0x8] sm:$0xff]  ;;  %v749_v9 = vmov 0.0|0.0  }
  0x57   : > { %537 = vmatprep.mubr.msk.f32.mxu1 %vm748_vm1, %v747_v5  ;;  %v335_v8 = vld [vmem:[#allocation5 + $0x10] sm:$0xff]  ;;  %540 = vmatprep.subr.bf16.mxu1 %v749_v9  ;;  %v541_v10 = vpack.c.bf16 %v334_v7, %v333_v6  ;;  %v336_v11 = vld [vmem:[#allocation5 + $0x18] sm:$0xff]  ;;  %vm259_vm2 = vcmask 64512   ;;  %v750_v32 = vmov 1.0   ;;  %s514_s29 = sshll.u32 %s798_s19, 4  ;;  %s226_s10 = scalar_lea.vmem [#allocation7], %s913_s25 }
  0x58   : > { %v236_v3 = vmul.f32 %v511_v1, %v228_v2  ;;  %v544_v12 = vpack.c.bf16 %v336_v11, %v335_v8  ;;  %v337_v35 = vld [vmem:[%s985_s3] sm:$0x1]  ;;  %s426_s14 = sshll.u32 %s226_s10, 4  ;;  %vm411_vm3 = vcmask 778240   ;;  %s938_s5 = scalar_lea.hbm %s986_s4, %s514_s29  ;;  %s940_s14 = int_to_ptr.vmem [resolvable:$true] %s426_s14 }
  0x59   : > { %542 = vmatpush3.bf16.msra.mxu1 %v541_v10  ;;  %s414_s7 = scalar_lea.sflag [#allocation4], %s913_s25  ;;  %s671_s26 = scalar_lea.vmem %s940_s14, 16 }
  0x5a   : > { %v238_v4 = vsel %vm237_vm0, %v236_v3, 0.0  ;;  %543 = vmatprep.subr.bf16.mxu1 %v749_v9  ;;  %p672_p4 = scmp.ne.s32.totalorder %s940_s14, %s671_s26  ;;  %s751_s19 = smov [#allocation7]  }
  0x5b   : > { %239 = vadd.xlane.f32.xlu0 %v238_v4  ;;  %s675_s8 = sshll.u32 %s751_s19, 4  ;;  %s676_s8 = int_to_ptr.vmem [resolvable:$false] %s675_s8 }
  0x5c   : > { %p673_p6 = pnand %p672_p4, %p868_p12  ;;  %s677_s11 = scalar_lea.vmem %s676_s8, 32 }
  0x5d   : > { %545 = vmatpush3.bf16.msra.mxu1 %v544_v12  ;;  %p678_p10 = scmp.lt.s32.totalorder %s940_s14, %s676_s8  ;;  %p679_p13 = scmp.lt.s32.totalorder %s677_s11, %s671_s26 }
  0x5e   : > { %p674_p8 = pneg %p673_p6 }
  0x5f   : > { %p680_p3 = por %p679_p13, %p678_p10 }
  0x61   : > { %p681_p7 = pnand %p680_p3, %p674_p8 }
  0xe8   : > { %v240_v13 = vpop.xlane.xlu0 %239 }
  0xe9   : > { %v241_v14 = vrot.slane %v240_v13, 4 }
  0xeb   : > { %v242_v15 = vmax.f32 %v240_v13, %v241_v14 }
  0xed   : > { %v243_v16 = vrot.slane %v242_v15, 2 }
  0xef   : > { %v244_v17 = vmax.f32 %v242_v15, %v243_v16 }
  0xf1   : > { %v245_v18 = vrot.slane %v244_v17, 1 }
  0xf3   : > { %v246_v19 = vmax.f32 %v244_v17, %v245_v18 }
  0xf5   : > { %v247_v20 = vsub.f32 %v240_v13, %v246_v19 }
  0xf7   : > { %v248_v21 = vmul.f32 1.442695, %v247_v20 }
  0xf9   : > { %609 = vpow2.f32 %v248_v21 }
 0x103   : > { %v610_v22 = vpop.eup %609 }
 0x104   : > { %v250_v23 = vrot.slane %v610_v22, 4 }
 0x106   : > { %v251_v24 = vadd.f32 %v610_v22, %v250_v23 }
 0x108   : > { %v252_v25 = vrot.slane %v251_v24, 2 }
 0x10a   : > { %v253_v26 = vadd.f32 %v252_v25, %v251_v24 }
 0x10c   : > { %v254_v27 = vrot.slane %v253_v26, 1 }
 0x10e   : > { %v255_v28 = vadd.f32 %v254_v27, %v253_v26 }
 0x110   : > { %611 = vrcp.f32 %v255_v28 }
 0x11a   : > { %v612_v29 = vpop.eup %611 }
 0x11b   : > { %v257_v30 = vmul.f32 %v612_v29, %v610_v22 }
 0x11d   : > { %v258_v31 = vmul.f32 %v257_v30, %v228_v2 }
 0x11f   : > { %525 = vmatpush3.msra.mxu0 %v258_v31 }
 0x120   : > { %527 = vmatmul.mubr.msk.f32.vlgmr.msra.gmra.mrb[0].mxu0 %vm259_vm2, %v750_v32 }
 0x1f3   : > { %v329_v33 = vpop.f32.mrb[0].mxu0 }
 0x1f4   : > { %v528_v34 = vpop.f32.mrb[1].mxu0  ;;  %538 = vmatmul.mubr.msk.f32.vlgmr.msra.gmra.mrb[0].mxu1 %vm237_vm0, %v329_v33 }
 0x2c7   : > { %v407_v36 = vpop.f32.mrb[0].mxu1 }
 0x2c8   : > { %v408_v37 = vadd.f32 %v407_v36, %v337_v35  ;;  %v539_v38 = vpop.f32.mrb[1].mxu1 }
 0x2ca   : > { %412 = vst.msk [vmem:[%s226_s10] sm:$0x1] %vm411_vm3, %v408_v37 }
 0x2cb   : > { %684 = shalt.err (!%p681_p7)
}
 0x2cc   : > { %s685_s25 = scalar_lea.hbm %s938_s5, 16  ;;  %s689_s23 = scalar_lea.hbm %s986_s4, 32 }
 0x2cd   : > { %p686_p9 = scmp.ne.s32.totalorder %s938_s5, %s685_s25  ;;  %p690_p0 = scmp.lt.u32.totalorder %s938_s5, %s986_s4 }
 0x2ce   : > { %p691_p1 = scmp.lt.u32.totalorder %s689_s23, %s685_s25  ;;  %p693_p4 = scmp.lt.u32.totalorder %s685_s25, %s938_s5 }
 0x2cf   : > { %p687_p2 = pnand %p686_p9, %p868_p12 }
 0x2d0   : > { %p692_p11 = por %p691_p1, %p690_p0 }
 0x2d1   : > { %p688_p5 = pneg %p687_p2 }
 0x2d2   : > { %p694_p6 = por %p693_p4, %p692_p11 }
 0x2d4   : > { %p695_p8 = pnand %p694_p6, %p688_p5 }
 0x2d6   : > { %698 = shalt.err (!%p695_p8)
}
 0x2d7   : > { %552 = dma.vmem_to_hbm [thread:$0]  (%p868_p12), %s940_s14, 16, %s938_s5, %s414_s7  }
 0x2d8 PF: > { %s438_s28 = sand.u32 1, %s729_s15   ;;  %p1001_p10 = scmp.ne.s32.totalorder %s991_s22, 0 }
 0x2d9   : > { %p1002_p13 = scmp.ge.s32.totalorder %s741_s18, 2  ;;  %s439_s29 = scalar_lea.sflag [#allocation4], %s438_s28 }
 0x2db   : > { %p563_p3 = pnand %p1002_p13, %p1001_p10 }
 0x2dd   : > { %724 = dma.done.wait (!%p563_p3), %s439_s29, 16  }
 0x2de   : > { %726 = vsyncadd (!%p563_p3), %s439_s29, 4294967280  ;;  %p18_p7 = scmp.ge.s32.totalorder %s833_s27, 4   ;;  %s1003_s15 = smov %s733_s16 }
 0x2df   : > { %s1004_s16 = smov %s737_s17  ;;  %s1005_s17 = smov %s864_s24 }
 0x2e0   : > { %s1006_s18 = smov %s833_s27  ;;  %20 = sbr.rel (!%p18_p7) target bundleno = 6 (0x6), region = 85 }
 0x2e7   :  { %443 = vsyncpa [#allocation3], 1 }
 0x2e8   :  { %445 = vsyncpa [#allocation3 + $0x1], 1 }
 0x2e9   :  { %446 = vsyncpa [#allocation6], 1 }
 0x2ea   :  { %447 = vsyncpa [#allocation4], 1 }
 0x2eb   :  { %449 = vsyncpa [#allocation4 + $0x1], 1 }

</bundles_post_ra>
